<compile_context>
chip_gen: v7x
topology: tpu7x:2x2x1
jax: 0.10.0
libtpu: 0.0.40
codegen_flags: <defaults>
</compile_context>

<pallas_src>
import jax
import jax.numpy as jnp
from jax.experimental import pallas as pl
from jax.experimental.pallas import tpu as pltpu

_HIDDEN = 256


def _round_up(a, m):
    return (a + m - 1) // m * m


def _nca_disc_kernel(x_ref, xn_ref, w1_ref, b1_ref, w2_ref, b2_ref,
                     o_ref, xall_ref):
    D = x_ref.shape[-1]
    cdt = xall_ref.dtype

    # cat([x, x_n], -1): two static masked-lane stores into the (TB, 2D) VMEM
    # scratch (cheap: (TB, D) << (TB, 256)).  Cast to the compute dtype on the
    # VPU here instead of a separate XLA astype pass over HBM.
    xall_ref[:, :D] = x_ref[...].astype(cdt)
    xall_ref[:, D:] = xn_ref[...].astype(cdt)

    # Layer 1: a single K=2D MXU matmul with f32 accumulation; bias + ReLU on
    # the VPU in f32 (v5e-safe).
    h = jnp.dot(xall_ref[...], w1_ref[...], preferred_element_type=jnp.float32)
    h = jnp.maximum(h + b1_ref[...], 0.0)
    # Dropout(0.5): identity at inference time.

    # Layer 2 (out_features = 1): VPU multiply + lane (XLU) reduction instead
    # of an N=1 MXU matmul; b2 comes from SMEM.
    p = jnp.sum(h * w2_ref[...], axis=-1, keepdims=True) + b2_ref[0]

    # (TB, 1) store -- output traffic is tiny, avoids a sublane->lane relayout.
    o_ref[...] = p.astype(o_ref.dtype)


def nca_discriminator_forward(x, x_n, w1, b1, w2, b2, *,
                              tb_max=4096, use_bf16=True):
    """x, x_n: (B, D).  w1: (2D, H) (pre-transposed (in, out)), b1: (H,),
    w2: (H, 1), b2: (1,).  Set use_bf16=False for a full-f32 parity path."""
    B, D = x.shape
    H = w1.shape[1]
    assert x_n.shape == (B, D)
    assert w1.shape == (2 * D, H)
    assert tb_max % 128 == 0

    compute_dtype = jnp.bfloat16 if use_bf16 else jnp.float32
    in_isz = jnp.dtype(x.dtype).itemsize
    c_isz = jnp.dtype(compute_dtype).itemsize

    def vmem_bytes(tb):
        return (2 * 2 * tb * D * in_isz      # x, x_n tiles (double-buffered)
                + 2 * D * H * c_isz          # W1 (single-buffered)
                + 2 * H * 4                  # b1, w2 rows
                + tb * 2 * D * c_isz         # x_all scratch
                + 2 * tb * 4                 # output blocks (double-buffered)
                + 3 * tb * H * 4)            # f32 hidden temporaries (headroom)

    VMEM_BUDGET = 40 << 20                   # v7x-safe (64 MiB physical / TC)

    # Batch tile: large enough to amortize the ~0.35us per-grid-step cost,
    # small enough to fit the VMEM budget, and split so >= 2 "parallel" tiles
    # exist when B allows it (v7x has 2 TensorCores).
    half = _round_up(pl.cdiv(B, 2), 128)
    TB = min(tb_max, half)
    while TB > 256 and vmem_bytes(TB) > VMEM_BUDGET:
        TB = _round_up(TB // 2, 128)
    if TB >= B:
        TB = B                               # single full-array tile, no padding
    num_tiles = pl.cdiv(B, TB)
    # NOTE: for very small B (single tile) a plain XLA path would be as fast;
    # we still run the kernel here for demonstration/correctness.

    # Only the tiny grid-invariant operands are cast/reshaped in the wrapper;
    # x / x_n are streamed as-is (cast happens in-kernel).
    w1_c = w1.astype(compute_dtype)
    b1_2d = b1.reshape(1, H).astype(jnp.float32)
    w2_row = w2.reshape(1, H).astype(jnp.float32)
    b2_1d = b2.reshape(1).astype(jnp.float32)

    vmem_limit = int(min(max(vmem_bytes(TB) + (2 << 20), 16 << 20), VMEM_BUDGET))

    out = pl.pallas_call(
        _nca_disc_kernel,
        out_shape=jax.ShapeDtypeStruct((B, 1), jnp.float32),
        grid=(num_tiles,),
        in_specs=[
            pl.BlockSpec((TB, D), lambda i: (i, 0)),     # x tile (streamed)
            pl.BlockSpec((TB, D), lambda i: (i, 0)),     # x_n tile (streamed)
            pl.BlockSpec((2 * D, H), lambda i: (0, 0),   # W1 (VMEM-resident)
                         pipeline_mode=pl.Buffered(1)),
            pl.BlockSpec((1, H), lambda i: (0, 0),       # b1 (resident)
                         pipeline_mode=pl.Buffered(1)),
            pl.BlockSpec((1, H), lambda i: (0, 0),       # W2 row (resident)
                         pipeline_mode=pl.Buffered(1)),
            pl.BlockSpec(memory_space=pltpu.MemorySpace.SMEM),  # b2 scalar
        ],
        out_specs=pl.BlockSpec((TB, 1), lambda i: (i, 0)),
        scratch_shapes=[pltpu.VMEM((TB, 2 * D), compute_dtype)],
        compiler_params=pltpu.CompilerParams(
            dimension_semantics=("parallel",),
            vmem_limit_bytes=vmem_limit),
    )(x, x_n, w1_c, b1_2d, w2_row, b2_1d)

    return out.reshape(-1)                   # matches p.view((-1,))


def init_params(key, input_size, hidden=_HIDDEN):
    """Mirrors the PyTorch module's init (weights pre-transposed to (in, out))."""
    k1, k2, k3, k4 = jax.random.split(key, 4)
    fan_in1, fan_out1 = 2 * input_size, hidden
    bound1 = (6.0 / (fan_in1 + fan_out1)) ** 0.5
    w1 = jax.random.uniform(k1, (fan_in1, fan_out1), jnp.float32, -bound1, bound1)
    bb1 = 1.0 / (fan_in1 ** 0.5)
    b1 = jax.random.uniform(k2, (fan_out1,), jnp.float32, -bb1, bb1)

    fan_in2, fan_out2 = hidden, 1
    bound2 = (6.0 / (fan_in2 + fan_out2)) ** 0.5
    w2 = jax.random.uniform(k3, (fan_in2, fan_out2), jnp.float32, -bound2, bound2)
    bb2 = 1.0 / (fan_in2 ** 0.5)
    b2 = jax.random.uniform(k4, (fan_out2,), jnp.float32, -bb2, bb2)
    return w1, b1, w2, b2


if __name__ == "__main__":
    key = jax.random.PRNGKey(0)
    kx, kxn, kp = jax.random.split(key, 3)

    batch = 16
    input_size = 32

    x = jax.random.normal(kx, (batch, input_size), jnp.float32)
    x_n = jax.random.normal(kxn, (batch, input_size), jnp.float32)
    w1, b1, w2, b2 = init_params(kp, input_size)

    p = nca_discriminator_forward(x, x_n, w1, b1, w2, b2)
    p = jax.block_until_ready(p)
    assert p.shape == (batch,)

    # Pure-JAX reference of the same compute path (bf16 layer-1 operands,
    # f32 accumulation and epilogue).
    x_all = jnp.concatenate([x, x_n], axis=-1)
    h_ref = jnp.maximum(
        jnp.dot(x_all.astype(jnp.bfloat16), w1.astype(jnp.bfloat16),
                preferred_element_type=jnp.float32) + b1, 0.0)
    p_ref = jnp.sum(h_ref * w2.reshape(1, -1), axis=-1) + b2[0]
    assert jnp.allclose(p, p_ref, atol=1e-4, rtol=1e-4), \
        f"max abs diff {jnp.max(jnp.abs(p - p_ref))}"

    # Sanity check vs the full-f32 PyTorch-equivalent math (loose: bf16 layer 1).
    h32 = jnp.maximum(x_all @ w1 + b1, 0.0)
    p32 = (h32 @ w2 + b2).reshape(-1)
    assert jnp.allclose(p, p32, atol=5e-2, rtol=5e-2)

    print("KERNEL_OK")
</pallas_src>

<mosaic_0001>
module attributes {stable_mosaic.version = 11 : i64} {
  func.func @_nca_disc_kernel(%arg0: i32, %arg1: memref<16x32xf32, #tpu.memory_space<vmem>>, %arg2: memref<16x32xf32, #tpu.memory_space<vmem>>, %arg3: memref<64x256xbf16, #tpu.memory_space<vmem>>, %arg4: memref<1x256xf32, #tpu.memory_space<vmem>>, %arg5: memref<1x256xf32, #tpu.memory_space<vmem>>, %arg6: memref<1xf32, #tpu.memory_space<smem>>, %arg7: memref<16x1xf32, #tpu.memory_space<vmem>>, %arg8: memref<16x64xbf16, #tpu.memory_space<vmem>>) attributes {dimension_semantics = [#tpu.dimension_semantics<parallel>], iteration_bounds = array<i64: 1>, scalar_prefetch = 0 : i64, scratch_operands = 1 : i64, tpu.core_type = #tpu.core_type<tc>, window_params = [{transform_indices = @transform_0, window_bounds = array<i64: 16, 32>}, {transform_indices = @transform_1, window_bounds = array<i64: 16, 32>}, {pipeline_mode = #tpu.pipeline_mode<synchronous>, transform_indices = @transform_2, window_bounds = array<i64: 64, 256>}, {pipeline_mode = #tpu.pipeline_mode<synchronous>, transform_indices = @transform_3, window_bounds = array<i64: 1, 256>}, {pipeline_mode = #tpu.pipeline_mode<synchronous>, transform_indices = @transform_4, window_bounds = array<i64: 1, 256>}, {transform_indices = @transform_5, window_bounds = array<i64: 1>}, {transform_indices = @transform_6, window_bounds = array<i64: 16, 1>}]} {
    %c0 = arith.constant 0 : index
    %c0_0 = arith.constant 0 : index
    %0 = vector.load %arg1[%c0, %c0_0] : memref<16x32xf32, #tpu.memory_space<vmem>>, vector<16x32xf32>
    %1 = arith.truncf %0 : vector<16x32xf32> to vector<16x32xbf16>
    %c0_1 = arith.constant 0 : index
    %c0_2 = arith.constant 0 : index
    %2 = vector.load %arg8[%c0_1, %c0_2] : memref<16x64xbf16, #tpu.memory_space<vmem>>, vector<16x32xbf16>
    tpu.vector_store %arg8[%c0_1, %c0_2], %1 {strides = array<i32>} : memref<16x64xbf16, #tpu.memory_space<vmem>>, vector<16x32xbf16>,
    %c0_3 = arith.constant 0 : index
    %c0_4 = arith.constant 0 : index
    %3 = vector.load %arg2[%c0_3, %c0_4] : memref<16x32xf32, #tpu.memory_space<vmem>>, vector<16x32xf32>
    %4 = arith.truncf %3 : vector<16x32xf32> to vector<16x32xbf16>
    %c0_5 = arith.constant 0 : index
    %c32 = arith.constant 32 : index
    %5 = vector.load %arg8[%c0_5, %c32] : memref<16x64xbf16, #tpu.memory_space<vmem>>, vector<16x32xbf16>
    tpu.vector_store %arg8[%c0_5, %c32], %4 {strides = array<i32>} : memref<16x64xbf16, #tpu.memory_space<vmem>>, vector<16x32xbf16>,
    %c0_6 = arith.constant 0 : index
    %c0_7 = arith.constant 0 : index
    %6 = vector.load %arg8[%c0_6, %c0_7] : memref<16x64xbf16, #tpu.memory_space<vmem>>, vector<16x64xbf16>
    %c0_8 = arith.constant 0 : index
    %c0_9 = arith.constant 0 : index
    %7 = vector.load %arg3[%c0_8, %c0_9] : memref<64x256xbf16, #tpu.memory_space<vmem>>, vector<64x256xbf16>
    %cst = arith.constant dense<0.000000e+00> : vector<16x256xf32>
    %8 = tpu.matmul %6, %7, %cst {dimension_numbers = #tpu.dot_dimension_numbers<[1], [0], [0], [1], [0, 0, 1, 1], [], []>} : vector<16x64xbf16>, vector<64x256xbf16>, vector<16x256xf32> -> vector<16x256xf32>
    %c0_10 = arith.constant 0 : index
    %c0_11 = arith.constant 0 : index
    %9 = vector.load %arg4[%c0_10, %c0_11] : memref<1x256xf32, #tpu.memory_space<vmem>>, vector<1x256xf32>
    %10 = vector.broadcast %9 : vector<1x256xf32> to vector<16x256xf32>
    %11 = arith.addf %8, %10 : vector<16x256xf32>
    %cst_12 = arith.constant 0.000000e+00 : f32
    %12 = vector.broadcast %cst_12 : f32 to vector<16x256xf32>
    %13 = arith.maximumf %11, %12 : vector<16x256xf32>
    %c0_13 = arith.constant 0 : index
    %c0_14 = arith.constant 0 : index
    %14 = vector.load %arg5[%c0_13, %c0_14] : memref<1x256xf32, #tpu.memory_space<vmem>>, vector<1x256xf32>
    %15 = vector.broadcast %14 : vector<1x256xf32> to vector<16x256xf32>
    %16 = arith.mulf %13, %15 : vector<16x256xf32>
    %cst_15 = arith.constant dense<0.000000e+00> : vector<16xf32>
    %17 = vector.multi_reduction <add>, %16, %cst_15 [1] : vector<16x256xf32> to vector<16xf32>
    %18 = vector.shape_cast %17 : vector<16xf32> to vector<16x1xf32>
    %c0_16 = arith.constant 0 : index
    %19 = memref.load %arg6[%c0_16] : memref<1xf32, #tpu.memory_space<smem>>
    %20 = vector.broadcast %19 : f32 to vector<16x1xf32>
    %21 = arith.addf %18, %20 : vector<16x1xf32>
    %c0_17 = arith.constant 0 : index
    %c0_18 = arith.constant 0 : index
    %22 = vector.load %arg7[%c0_17, %c0_18] : memref<16x1xf32, #tpu.memory_space<vmem>>, vector<16x1xf32>
    tpu.vector_store %arg7[%c0_17, %c0_18], %21 {strides = array<i32>} : memref<16x1xf32, #tpu.memory_space<vmem>>, vector<16x1xf32>,
    return
  }
  func.func @transform_0(%arg0: i32) -> (i32, i32) {
    %c0_i32 = arith.constant 0 : i32
    %c0_i32_0 = arith.constant 0 : i32
    return %arg0, %c0_i32 : i32, i32
  }
  func.func @transform_1(%arg0: i32) -> (i32, i32) {
    %c0_i32 = arith.constant 0 : i32
    %c0_i32_0 = arith.constant 0 : i32
    return %arg0, %c0_i32 : i32, i32
  }
  func.func @transform_2(%arg0: i32) -> (i32, i32) {
    %c0_i32 = arith.constant 0 : i32
    %c0_i32_0 = arith.constant 0 : i32
    %c0_i32_1 = arith.constant 0 : i32
    return %c0_i32, %c0_i32_0 : i32, i32
  }
  func.func @transform_3(%arg0: i32) -> (i32, i32) {
    %c0_i32 = arith.constant 0 : i32
    %c0_i32_0 = arith.constant 0 : i32
    %c0_i32_1 = arith.constant 0 : i32
    return %c0_i32, %c0_i32_0 : i32, i32
  }
  func.func @transform_4(%arg0: i32) -> (i32, i32) {
    %c0_i32 = arith.constant 0 : i32
    %c0_i32_0 = arith.constant 0 : i32
    %c0_i32_1 = arith.constant 0 : i32
    return %c0_i32, %c0_i32_0 : i32, i32
  }
  func.func @transform_5(%arg0: i32) -> i32 {
    %c0_i32 = arith.constant 0 : i32
    %c0_i32_0 = arith.constant 0 : i32
    return %c0_i32 : i32
  }
  func.func @transform_6(%arg0: i32) -> (i32, i32) {
    %c0_i32 = arith.constant 0 : i32
    %c0_i32_0 = arith.constant 0 : i32
    return %arg0, %c0_i32 : i32, i32
  }
}

</mosaic_0001>

<bundles_post_ra>
// kernel: tpu_custom_call.1
= control target key start
LH: loop header
LB: loop body
LE: loop exit
PB: predicated region body
PF: predicated region fallthrough
CT: control target
= control target key end

     0   :  { %12 = vsyncpa [#allocation5], 0  ;;  %s434_s0 = inlined_call_operand.hbm [shape: f32[16,32], index: 0, kind: input, shape index: {}]   ;;  %s435_s1 = inlined_call_operand.hbm [shape: f32[16,32], index: 1, kind: input, shape index: {}]   ;;  %s436_s2 = inlined_call_operand.hbm [shape: bf16[64,256], index: 2, kind: input, shape index: {}]   ;;  %s437_s3 = inlined_call_operand.vmem [shape: f32[1,256], index: 3, kind: input, shape index: {}]   ;;  %s438_s4 = inlined_call_operand.vmem [shape: f32[1,256], index: 4, kind: input, shape index: {}]   ;;  %s439_s5 = inlined_call_operand.<no memory space> [shape: f32[1], index: 5, kind: input, shape index: {}]   ;;  %s440_s6 = inlined_call_operand.vmem [shape: f32[16,1], index: 6, kind: output, shape index: {}]  }
   0x1   :  { %13 = vsyncpa [#allocation7], 0  ;;  %s325_s21 = smov [#allocation6]   ;;  %s326_s23 = smov [#allocation4]  }
   0x2   :  { %s31_s22 = sshll.u32 %s325_s21, 4  ;;  %s19_s24 = sshll.u32 %s326_s23, 4  ;;  %s32_s22 = int_to_ptr.vmem [resolvable:$true] %s31_s22  ;;  %s367_s24 = int_to_ptr.vmem [resolvable:$true] %s19_s24 }
   0x3   :  { %s255_s27 = scalar_lea.hbm %s435_s1, 256 }
   0x4   :  { %p256_p0 = scmp.ne.s32.totalorder %s435_s1, %s255_s27  ;;  %p259_p1 = scmp.lt.u32.totalorder %s255_s27, %s435_s1 }
   0x6   :  { %p261_p2 = pnand %p259_p1, %p256_p0 }
   0x8   :  { %264 = shalt.err (!%p261_p2)
}
   0x9   :  { %s265_s8 = scalar_lea.vmem %s32_s22, 256  ;;  %p270_p4 = scmp.lt.s32.totalorder %s32_s22, %s32_s22 }
   0xa   :  { %p266_p3 = scmp.ne.s32.totalorder %s32_s22, %s265_s8  ;;  %p271_p5 = scmp.lt.s32.totalorder %s265_s8, %s265_s8 }
   0xc   :  { %p272_p6 = por %p271_p5, %p270_p4 }
   0xe   :  { %p273_p7 = pnand %p272_p6, %p266_p3 }
  0x10   :  { %276 = shalt.err (!%p273_p7)
}
  0x11   :  { %s327_s9 = smov 128   ;;  %s328_s10 = smov 8  }
  0x12   :  { %37 = dma.hbm_to_vmem [thread:$0]  %s435_s1, 256, %s32_s22, [#allocation7], %s327_s9, %s327_s9, %s328_s10  }
  0x13   :  { %s277_s15 = scalar_lea.hbm %s434_s0, 256 }
  0x14   :  { %p278_p8 = scmp.ne.s32.totalorder %s434_s0, %s277_s15  ;;  %p281_p9 = scmp.lt.u32.totalorder %s277_s15, %s434_s0 }
  0x16   :  { %p283_p10 = pnand %p281_p9, %p278_p8 }
  0x18   :  { %286 = shalt.err (!%p283_p10)
}
  0x19   :  { %s287_s20 = scalar_lea.vmem %s367_s24, 256  ;;  %p292_p12 = scmp.lt.s32.totalorder %s367_s24, %s367_s24 }
  0x1a   :  { %p288_p11 = scmp.ne.s32.totalorder %s367_s24, %s287_s20  ;;  %p293_p13 = scmp.lt.s32.totalorder %s287_s20, %s287_s20 }
  0x1c   :  { %p294_p0 = por %p293_p13, %p292_p12 }
  0x1e   :  { %p295_p1 = pnand %p294_p0, %p288_p11 }
  0x20   :  { %298 = shalt.err (!%p295_p1)
}
  0x21   :  { %25 = dma.hbm_to_vmem [thread:$0]  %s434_s0, 256, %s367_s24, [#allocation5], %s327_s9, %s327_s9, %s328_s10  }
  0x22   :  { %s329_s22 = smov [#allocation8]   ;;  %s299_s27 = scalar_lea.hbm %s436_s2, 1024 }
  0x23   :  { %s43_s23 = sshll.u32 %s329_s22, 4  ;;  %p300_p2 = scmp.ne.s32.totalorder %s436_s2, %s299_s27  ;;  %s44_s23 = int_to_ptr.vmem [resolvable:$true] %s43_s23 }
  0x24   :  { %p303_p3 = scmp.lt.u32.totalorder %s299_s27, %s436_s2 }
  0x26   :  { %p305_p4 = pnand %p303_p3, %p300_p2 }
  0x28   :  { %308 = shalt.err (!%p305_p4)
}
  0x29   :  { %s309_s8 = scalar_lea.vmem %s44_s23, 1024  ;;  %p314_p6 = scmp.lt.s32.totalorder %s44_s23, %s44_s23 }
  0x2a   :  { %p310_p5 = scmp.ne.s32.totalorder %s44_s23, %s309_s8  ;;  %p315_p7 = scmp.lt.s32.totalorder %s309_s8, %s309_s8 }
  0x2c   :  { %p316_p8 = por %p315_p7, %p314_p6 }
  0x2e   :  { %p317_p9 = pnand %p316_p8, %p310_p5 }
  0x30   :  { %320 = shalt.err (!%p317_p9)
}
  0x31   :  { %49 = dma.hbm_to_vmem [thread:$0]  %s436_s2, 1024, %s44_s23, [#allocation7], %s327_s9, %s327_s9, %s328_s10  }
  0x32   :  { %321 = dma.done.wait [#allocation5], 256  }
  0x33   :  { %322 = vsyncadd [#allocation5], 4294967040 }
  0x34   :  { %323 = dma.done.wait [#allocation7], 1280  }
  0x35   :  { %324 = vsyncadd [#allocation7], 4294966016  ;;  %v330_v0 = vmov 0   ;;  %v71_v1 = vld [vmem:[#allocation6] sm:$0xff]  ;;  %v72_v2 = vld [vmem:[#allocation6 + $0x8] sm:$0xff]  ;;  %s331_s11 = smov 32   ;;  %v91_v17 = vlaneseq  ;;  %v215_v45 = vstv %s439_s5 }
  0x36   :  { %177 = vmatprep.mubr.bf16.mxu0 %v330_v0  ;;  %v73_v3 = vpack.c.bf16 %v72_v2, %v71_v1  ;;  %v243_v4 = vld [vmem:[#allocation8 + $0x4] ss:$8 sps:$4 sm:$0xff]   ;;  %v245_v5 = vld [vmem:[#allocation8] ss:$8 sps:$4 sm:$0xff]   ;;  %v246_v6 = vld [vmem:[#allocation8 + $0x14] ss:$8 sps:$4 sm:$0xff]  }
  0x37   :  { %145 = vmatprep.subr.bf16.mxu0 %v243_v4  ;;  %vm69_vm0 = vcmask 261120   ;;  %v66_v7 = vld [vmem:[#allocation4] sm:$0xff]  ;;  %v67_v8 = vld [vmem:[#allocation4 + $0x8] sm:$0xff]  ;;  %v248_v9 = vld [vmem:[#allocation8 + $0x10] ss:$8 sps:$4 sm:$0xff]   ;;  %vm78_vm1 = vcmask 523520  }
  0x38   :  { %75 = vrot.lane.b32.xlu0 %v73_v3, %s331_s11  ;;  %146 = vmatpush1.bf16.msra.mxu0 %v245_v5  ;;  %v68_v10 = vpack.c.bf16 %v67_v8, %v66_v7  ;;  %v249_v11 = vld [vmem:[#allocation8 + $0x24] ss:$8 sps:$4 sm:$0xff]   ;;  %v251_v12 = vld [vmem:[#allocation8 + $0x20] ss:$8 sps:$4 sm:$0xff]   ;;  %v252_v13 = vld [vmem:[#allocation8 + $0x34] ss:$8 sps:$4 sm:$0xff]  }
  0x39   :  { %147 = vmatprep.subr.bf16.mxu0 %v246_v6  ;;  %v254_v14 = vld [vmem:[#allocation8 + $0x30] ss:$8 sps:$4 sm:$0xff]   ;;  %vm141_vm2 = vcmask 523264   ;;  %v92_v18 = vshrl.u32 %v91_v17, 7  ;;  %vm218_vm3 = vcmask 7168  }
  0x3a   :  { %70 = vst.msk [vmem:[#allocation2] sm:$0xff] %vm69_vm0, %v68_v10  ;;  %v89_v20 = vld [vmem:[%s437_s3] sm:$0x3] }
  0x3b   :  { %v93_v19 = vsub.s32 0, %v92_v18  ;;  %v97_v21 = vsub.s32 1, %v92_v18  ;;  %v192_v23 = vld [vmem:[%s438_s4] sm:$0x3] }
  0x3c   :  { %148 = vmatpush1.bf16.msra.mxu0 %v248_v9 }
  0x3d   :  { %149 = vmatprep.subr.bf16.mxu0 %v249_v11  ;;  %v94_v22 = vrot.slane %v89_v20, %v93_v19  ;;  %v98_v24 = vrot.slane %v89_v20, %v97_v21  ;;  %v197_v27 = vrot.slane %v192_v23, %v93_v19  ;;  %v201_v30 = vrot.slane %v192_v23, %v97_v21 }
  0x40   :  { %150 = vmatpush1.bf16.msra.mxu0 %v251_v12 }
  0x41   :  { %151 = vmatprep.subr.bf16.mxu0 %v252_v13 }
  0x44   :  { %152 = vmatpush1.bf16.msra.mxu0 %v254_v14 }
  0xaa   :  { %v76_v15 = vpop.permute.xlu0 %75 }
  0xab   :  { %79 = vst.msk [vmem:[#allocation2] sm:$0xff] %vm78_vm1, %v76_v15 }
  0xb2   :  { %v80_v16 = vld [vmem:[#allocation2] sm:$0xff] }
  0xb3   :  { %235 = vmatmul.mubr.msk.bf16.vlgmr.msra.gmra.mrb[0].mxu0 %vm141_vm2, %v80_v16 }
 0x186   :  { %v179_v25 = vpop.f32.mrb[0].mxu0 }
 0x187   :  { %v180_v26 = vadd.f32 %v179_v25, %v94_v22  ;;  %v181_v28 = vpop.f32.mrb[1].mxu0 }
 0x188   :  { %v182_v29 = vadd.f32 %v181_v28, %v98_v24  ;;  %v183_v31 = vpop.f32.mrb[2].mxu0 }
 0x189   :  { %v188_v32 = vmax.f32 %v180_v26, 0.0  ;;  %v184_v33 = vadd.f32 %v183_v31, %v94_v22  ;;  %v185_v34 = vpop.f32.mrb[3].mxu0 }
 0x18a   :  { %v189_v35 = vmax.f32 %v182_v29, 0.0  ;;  %v186_v36 = vadd.f32 %v185_v34, %v98_v24 }
 0x18b   :  { %v204_v37 = vmul.f32 %v197_v27, %v188_v32  ;;  %v190_v38 = vmax.f32 %v184_v33, 0.0 }
 0x18c   :  { %v205_v39 = vmul.f32 %v201_v30, %v189_v35  ;;  %v191_v40 = vmax.f32 %v186_v36, 0.0 }
 0x18d   :  { %v206_v41 = vmul.f32 %v197_v27, %v190_v38 }
 0x18e   :  { %v208_v42 = vadd.f32 %v205_v39, %v204_v37  ;;  %v207_v43 = vmul.f32 %v201_v30, %v191_v40 }
 0x190   :  { %209 = vadd.xlane.f32.xlu0 %v208_v42  ;;  %v211_v44 = vadd.f32 %v207_v43, %v206_v41 }
 0x192   :  { %212 = vadd.xlane.f32.xlu1 %v211_v44 }
 0x21d   :  { %v210_v46 = vpop.xlane.xlu0 %209 }
 0x21e   :  { %v216_v47 = vadd.f32 %v215_v45, %v210_v46 }
 0x21f   :  { %v213_v48 = vpop.xlane.xlu1 %212 }
 0x220   :  { %219 = vst.msk [vmem:[%s440_s6] sm:$0xff] %vm218_vm3, %v216_v47  ;;  %v217_v49 = vadd.f32 %v215_v45, %v213_v48 }
 0x222   :  { %220 = vst.msk [vmem:[%s440_s6 + $0x8] sm:$0xff] %vm218_vm3, %v217_v49 }
 0x223   :  { %225 = vsyncpa [#allocation5], 1 }
 0x224   :  { %226 = vsyncpa [#allocation7], 1 }

</bundles_post_ra>
